<compile_context>
chip_gen: v5e
topology: v5e:2x2
jax: 0.10.0
libtpu: 0.0.40
codegen_flags: <defaults>
</compile_context>

<pallas_src>
import functools

import jax
import jax.numpy as jnp
from jax.experimental import pallas as pl
from jax.experimental.pallas import tpu as pltpu


# ----------------------------- Pallas kernel --------------------------------

def _cbr_kernel(x_ref, w_ref, b_ref, o_ref):
    # x_ref: (Cin, TVB)   one lane-dense tile of flattened (T*V) positions
    # w_ref: (Cout, Cin)  conv weight with BN scale folded in (same dtype as x)
    # b_ref: (Cout, 1)    folded BN shift + conv bias, float32
    # o_ref: (Cout, TVB)  float32 output tile
    acc = jnp.dot(w_ref[...], x_ref[...], preferred_element_type=jnp.float32)
    o_ref[...] = (acc + b_ref[...]).astype(o_ref.dtype)


def _cbr_1x1(x3, w_scaled, bias, *, tile_cap=2048,
             vmem_limit_bytes=32 * 1024 * 1024):
    """x3: (N, Cin, P), w_scaled: (Cout, Cin), bias: (Cout, 1) f32 -> (N, Cout, P) f32."""
    N, Cin, P = x3.shape
    Cout = w_scaled.shape[0]
    assert tile_cap % 128 == 0
    # Full position axis if it fits, otherwise a 128-multiple tile; the ragged
    # last tile is handled by Pallas (input padding / masked output writeback).
    tvb = P if P <= tile_cap else tile_cap
    grid = (N, pl.cdiv(P, tvb))
    return pl.pallas_call(
        _cbr_kernel,
        out_shape=jax.ShapeDtypeStruct((N, Cout, P), jnp.float32),
        grid=grid,
        in_specs=[
            pl.BlockSpec((None, Cin, tvb), lambda n, j: (n, 0, j)),
            pl.BlockSpec((Cout, Cin), lambda n, j: (0, 0)),
            pl.BlockSpec((Cout, 1), lambda n, j: (0, 0)),
        ],
        out_specs=pl.BlockSpec((None, Cout, tvb), lambda n, j: (n, 0, j)),
        compiler_params=pltpu.CompilerParams(
            dimension_semantics=("parallel", "parallel"),
            vmem_limit_bytes=vmem_limit_bytes),
    )(x3, w_scaled, bias)


# ----------------------------- ResBlock wrapper ------------------------------

def resblock_forward(x, params, *, in_channels, out_channels, mode="TV",
                     kernel_size=1, stride=1, residual=True, eps=1e-5,
                     tile_cap=2048):
    """x: (N, C_in, T, V), NCHW like the PyTorch module. Inference-mode BN only."""
    if not residual:
        # Matches the PyTorch `lambda x: 0`; callers rely on broadcasting.
        return jnp.zeros((), dtype=x.dtype)
    if in_channels == out_channels and stride == 1:
        return x

    # CBRBlock(relu=False) path.
    # TODO(synk): only kernel_size=1 (the module default) is implemented; a
    # temporal ks>1 conv needs a tap loop / halo blocks in the kernel.
    assert kernel_size == 1, "only kernel_size=1 implemented"

    N, Cin, T, V = x.shape
    Cout = out_channels

    w = params["conv_w"].reshape(Cout, Cin).astype(jnp.float32)
    scale = params["bn_gamma"] / jnp.sqrt(params["bn_var"] + eps)        # (Cout,)
    w_scaled = (w * scale[:, None]).astype(x.dtype)                      # fold BN scale into W
    bias = (params["bn_beta"] - params["bn_mean"] * scale
            + params["conv_b"] * scale).astype(jnp.float32).reshape(Cout, 1)

    if stride > 1:
        # TODO(synk): fold the stride into the BlockSpec DMA instead of this
        # decimating slice; the slice copies only 1/stride of x (no transpose).
        x = x[:, :, ::stride, :] if mode == "TV" else x[:, :, :, ::stride]
    _, _, To, Vo = x.shape

    # Free (contiguous) reshape: positions onto the lane axis, channels on sublanes.
    x3 = x.reshape(N, Cin, To * Vo)
    y3 = _cbr_1x1(x3, w_scaled, bias, tile_cap=tile_cap)
    return y3.reshape(N, Cout, To, Vo)


# ----------------------------------- main ------------------------------------

if __name__ == "__main__":
    # ---- Test 1: demo shape (N C T V), f32, CBR path with stride=2 over T ----
    N, Cin, Cout, T, V = 2, 4, 8, 16, 16
    stride = 2

    key = jax.random.PRNGKey(0)
    kx, kw, kb, kg, kbeta, km, kv = jax.random.split(key, 7)
    x = jax.random.normal(kx, (N, Cin, T, V), dtype=jnp.float32)
    params = {
        "conv_w": jax.random.normal(kw, (Cout, Cin, 1, 1), dtype=jnp.float32) * 0.1,
        "conv_b": jax.random.normal(kb, (Cout,), dtype=jnp.float32) * 0.1,
        "bn_gamma": 1.0 + 0.1 * jax.random.normal(kg, (Cout,), dtype=jnp.float32),
        "bn_beta": 0.1 * jax.random.normal(kbeta, (Cout,), dtype=jnp.float32),
        "bn_mean": 0.1 * jax.random.normal(km, (Cout,), dtype=jnp.float32),
        "bn_var": jnp.abs(jax.random.normal(kv, (Cout,), dtype=jnp.float32)) + 0.5,
    }

    fwd = functools.partial(resblock_forward, in_channels=Cin, out_channels=Cout,
                            mode="TV", kernel_size=1, stride=stride, residual=True)
    out = jax.block_until_ready(jax.jit(lambda xx: fwd(xx, params))(x))

    # Pure-JAX reference (PyTorch semantics: conv -> BN inference form).
    w2 = params["conv_w"].reshape(Cout, Cin)
    xs = x[:, :, ::stride, :]
    conv = jnp.einsum("nctv,oc->notv", xs, w2) + params["conv_b"][None, :, None, None]
    scale = params["bn_gamma"] / jnp.sqrt(params["bn_var"] + 1e-5)
    shift = params["bn_beta"] - params["bn_mean"] * scale
    ref = conv * scale[None, :, None, None] + shift[None, :, None, None]
    assert out.shape == (N, Cout, T // stride, V), out.shape
    assert jnp.allclose(out, ref, atol=1e-4, rtol=1e-4), float(jnp.max(jnp.abs(out - ref)))

    # ---- Test 2: bf16 activations, skeleton-like shape (V=25), ragged tiles ----
    N2, Cin2, Cout2, T2, V2 = 2, 48, 64, 20, 25          # positions = 500 (ragged vs 256 tile)
    k2x, k2w, k2b = jax.random.split(jax.random.PRNGKey(1), 3)
    x2 = jax.random.normal(k2x, (N2, Cin2, T2, V2), dtype=jnp.float32).astype(jnp.bfloat16)
    p2 = {
        "conv_w": 0.1 * jax.random.normal(k2w, (Cout2, Cin2, 1, 1), dtype=jnp.float32),
        "conv_b": 0.1 * jax.random.normal(k2b, (Cout2,), dtype=jnp.float32),
        "bn_gamma": jnp.ones((Cout2,), jnp.float32),
        "bn_beta": jnp.zeros((Cout2,), jnp.float32),
        "bn_mean": jnp.zeros((Cout2,), jnp.float32),
        "bn_var": jnp.ones((Cout2,), jnp.float32),
    }
    out2 = jax.block_until_ready(
        jax.jit(lambda xx: resblock_forward(
            xx, p2, in_channels=Cin2, out_channels=Cout2, mode="TV",
            kernel_size=1, stride=1, residual=True, tile_cap=256))(x2))

    # Matched-precision reference (same bf16-rounded operands, f32 math).
    scale2 = p2["bn_gamma"] / jnp.sqrt(p2["bn_var"] + 1e-5)
    w2s = (p2["conv_w"].reshape(Cout2, Cin2) * scale2[:, None]).astype(jnp.bfloat16)
    bias2 = p2["bn_beta"] - p2["bn_mean"] * scale2 + p2["conv_b"] * scale2
    ref2 = (jnp.einsum("oc,nctv->notv", w2s.astype(jnp.float32), x2.astype(jnp.float32))
            + bias2[None, :, None, None])
    assert out2.shape == (N2, Cout2, T2, V2), out2.shape
    assert jnp.allclose(out2, ref2, atol=2e-3, rtol=2e-3), float(jnp.max(jnp.abs(out2 - ref2)))

    # ---- Identity and zero branches (no kernel needed) ----
    ident = resblock_forward(x, params, in_channels=Cin, out_channels=Cin,
                             stride=1, residual=True)
    zero = resblock_forward(x, params, in_channels=Cin, out_channels=Cout,
                            stride=stride, residual=False)
    assert ident.shape == x.shape
    assert zero.shape == ()

    print("KERNEL_OK")
</pallas_src>

<mosaic_0001>
module attributes {stable_mosaic.version = 11 : i64} {
  func.func @_cbr_kernel(%arg0: i32, %arg1: i32, %arg2: memref<1x4x128xf32, #tpu.memory_space<vmem>>, %arg3: memref<8x4xf32, #tpu.memory_space<vmem>>, %arg4: memref<8x1xf32, #tpu.memory_space<vmem>>, %arg5: memref<1x8x128xf32, #tpu.memory_space<vmem>>) attributes {dimension_semantics = [#tpu.dimension_semantics<parallel>, #tpu.dimension_semantics<parallel>], iteration_bounds = array<i64: 2, 1>, scalar_prefetch = 0 : i64, scratch_operands = 0 : i64, tpu.core_type = #tpu.core_type<tc>, window_params = [{transform_indices = @transform_0, window_bounds = array<i64: 1, 4, 128>}, {pipeline_mode = #tpu.pipeline_mode<synchronous>, transform_indices = @transform_1, window_bounds = array<i64: 8, 4>}, {pipeline_mode = #tpu.pipeline_mode<synchronous>, transform_indices = @transform_2, window_bounds = array<i64: 8, 1>}, {transform_indices = @transform_3, window_bounds = array<i64: 1, 8, 128>}]} {
    %c0 = arith.constant 0 : index
    %c0_0 = arith.constant 0 : index
    %0 = vector.load %arg3[%c0, %c0_0] : memref<8x4xf32, #tpu.memory_space<vmem>>, vector<8x4xf32>
    %c0_1 = arith.constant 0 : index
    %c0_2 = arith.constant 0 : index
    %c0_3 = arith.constant 0 : index
    %1 = vector.load %arg2[%c0_1, %c0_2, %c0_3] : memref<1x4x128xf32, #tpu.memory_space<vmem>>, vector<1x4x128xf32>
    %2 = vector.shape_cast %1 : vector<1x4x128xf32> to vector<4x128xf32>
    %cst = arith.constant dense<0.000000e+00> : vector<8x128xf32>
    %3 = tpu.matmul %0, %2, %cst {dimension_numbers = #tpu.dot_dimension_numbers<[1], [0], [0], [1], [0, 0, 1, 1], [], []>} : vector<8x4xf32>, vector<4x128xf32>, vector<8x128xf32> -> vector<8x128xf32>
    %c0_4 = arith.constant 0 : index
    %c0_5 = arith.constant 0 : index
    %4 = vector.load %arg4[%c0_4, %c0_5] : memref<8x1xf32, #tpu.memory_space<vmem>>, vector<8x1xf32>
    %5 = vector.broadcast %4 : vector<8x1xf32> to vector<8x128xf32>
    %6 = arith.addf %3, %5 : vector<8x128xf32>
    %c0_6 = arith.constant 0 : index
    %c0_7 = arith.constant 0 : index
    %c0_8 = arith.constant 0 : index
    %7 = vector.load %arg5[%c0_6, %c0_7, %c0_8] : memref<1x8x128xf32, #tpu.memory_space<vmem>>, vector<1x8x128xf32>
    %8 = vector.shape_cast %7 : vector<1x8x128xf32> to vector<8x128xf32>
    %9 = vector.shape_cast %6 : vector<8x128xf32> to vector<1x8x128xf32>
    tpu.vector_store %arg5[%c0_6, %c0_7, %c0_8], %9 {strides = array<i32>} : memref<1x8x128xf32, #tpu.memory_space<vmem>>, vector<1x8x128xf32>,
    return
  }
  func.func @transform_0(%arg0: i32, %arg1: i32) -> (i32, i32, i32) {
    %c0_i32 = arith.constant 0 : i32
    %c0_i32_0 = arith.constant 0 : i32
    return %arg0, %c0_i32, %arg1 : i32, i32, i32
  }
  func.func @transform_1(%arg0: i32, %arg1: i32) -> (i32, i32) {
    %c0_i32 = arith.constant 0 : i32
    %c0_i32_0 = arith.constant 0 : i32
    %c0_i32_1 = arith.constant 0 : i32
    return %c0_i32, %c0_i32_0 : i32, i32
  }
  func.func @transform_2(%arg0: i32, %arg1: i32) -> (i32, i32) {
    %c0_i32 = arith.constant 0 : i32
    %c0_i32_0 = arith.constant 0 : i32
    %c0_i32_1 = arith.constant 0 : i32
    return %c0_i32, %c0_i32_0 : i32, i32
  }
  func.func @transform_3(%arg0: i32, %arg1: i32) -> (i32, i32, i32) {
    %c0_i32 = arith.constant 0 : i32
    %c0_i32_0 = arith.constant 0 : i32
    return %arg0, %c0_i32, %arg1 : i32, i32, i32
  }
}

</mosaic_0001>

<bundles_post_ra>
// kernel: _lambda_.1
= control target key start
LH: loop header
LB: loop body
LE: loop exit
PB: predicated region body
PF: predicated region fallthrough
CT: control target
= control target key end

     0   :  { %s390_s12 = smov 0   ;;  %s392_s13 = smov 0   ;;  %s426_s0 = inlined_call_operand.vmem [shape: f32[2,4,128], index: 0, kind: input, shape index: {}]   ;;  %s427_s1 = inlined_call_operand.vmem [shape: f32[8,4], index: 1, kind: input, shape index: {}]   ;;  %s428_s2 = inlined_call_operand.vmem [shape: f32[8,1], index: 2, kind: input, shape index: {}]   ;;  %s429_s3 = inlined_call_operand.vmem [shape: f32[2,8,128], index: 3, kind: output, shape index: {}]  }
   0x1   :  { %s394_s14 = smov 0  }
   0x2 LB: > { %s25_s15 = sadd.s32 1, %s363_s13  ;;  %p312_p0 = scmp.ge.s32.totalorder %s367_s14, 1  ;;  %s367_s14 = sphi %s394_s14, %s13_s14   ;;  %s363_s13 = sphi %s392_s13, %s431_s13   ;;  %s359_s12 = sphi %s390_s12, %s430_s12  }
   0x3   : > { %p27_p1 = scmp.ge.s32.totalorder %s25_s15, 2  ;;  %p155_p2 = scmp.lt.s32.totalorder %s367_s14, 3 }
   0x5   : > { %s433_s15 = smov (%p27_p1, %s25_s15), 0  ;;  %p156_p3 = pnand %p312_p0, %p155_p2 }
   0x6   : > { %p183_p4 = scmp.lt.s32.totalorder (!%p156_p3), %s359_s12, 1 }
   0x7   : > { %159 = sbr.rel (%p156_p3) target bundleno = 146 (0x92), region = 32 }
   0xc   : > { %v199_v0 = vld [vmem:[%s428_s2] sm:$0xff]  ;;  %v369_v1 = vmov 0   ;;  %s435_s12 = smov (!%p183_p4, %s359_s12), 1  ;;  %vm209_vm0 = vcmask 1043456   ;;  %vm205_vm1 = vcmask 31744  }
   0xd   : > { %344 = vset.pattern.permute.xlu0 %v369_v1  ;;  %s313_s18 = sshll.u32 %s435_s12, 2  ;;  %v197_v2 = vld [vmem:[%s427_s1] sm:$0xff]  ;;  %s314_s24 = sshll.u32 %s435_s12, 3 }
   0xe   : > { %202 = vperm.xlu0 %344, %v199_v0   ;;  %s189_s21 = scalar_lea.vmem %s426_s0, %s313_s18  ;;  %s196_s27 = scalar_lea.vmem %s429_s3, %s314_s24 }
   0xf   : > { %v198_v3 = vld [vmem:[%s189_s21] sm:$0xf] }
  0x10   : > { %315 = vmatpush.msk.msra.mxu0 %vm209_vm0, %v198_v3 }
  0x11   : > { %316 = vmatmul.msk.f32.vlgmr.msra.gmra.mxu0 %vm205_vm1, %v197_v2 }
  0x80   : > { %v203_v4 = vpop.permute.xlu0 %202 }
  0x8e   : > { %v230_v5 = vpop.f32.mrf.mxu0 }
  0x8f   : > { %v231_v6 = vadd.f32 %v230_v5, %v203_v4 }
  0x91   : > { %233 = vst [vmem:[%s196_s27] sm:$0xff] %v231_v6 }
  0x92 PF: > { %s13_s14 = sadd.s32 1, %s367_s14   ;;  %s430_s12 = smov %s363_s13 }
  0x93   : > { %p10_p5 = scmp.ge.s32.totalorder %s13_s14, 4   ;;  %s431_s13 = smov %s433_s15 }
  0x95   :  { %12 = sbr.rel (!%p10_p5) target bundleno = 2 (0x2), region = 62 }

</bundles_post_ra>
